<compile_context>
chip_gen: v7x
topology: tpu7x:2x2x1
jax: 0.10.0
libtpu: 0.0.40
codegen_flags: <defaults>
</compile_context>

<pallas_src>
import functools

import jax
import jax.numpy as jnp
from jax.experimental import pallas as pl
from jax.experimental.pallas import tpu as pltpu


_VMEM_LIMIT_BYTES = 48 * 1024 * 1024          # < v7x 64 MiB physical; > v5e/v6e scoped defaults
_RESIDENT_WEIGHT_BYTES = 8 * 1024 * 1024      # keep whole weight in VMEM below this size


# ----------------------------- helpers ------------------------------


def _pick_tile(dim, cap, align=128):
    """Largest tile <= cap that divides dim, preferring multiples of `align`."""
    if dim <= cap:
        return dim
    t = (cap // align) * align
    while t >= align:
        if dim % t == 0:
            return t
        t -= align
    for t in range(cap, 0, -1):
        if dim % t == 0:
            return t
    return dim


def _apply_activation(y, activation):
    if activation == "gelu":
        # TODO(synk): HF BERT uses erf-based GELU; tanh approximation used for robust Mosaic lowering.
        return jax.nn.gelu(y, approximate=True)
    if activation == "tanh":
        return jnp.tanh(y)
    return y


# ----------------------------- linear (resident-weight + tiled fallback) ---------------


def _linear_resident_kernel(x_ref, w_ref, b_ref, o_ref, *, activation):
    y = jnp.dot(x_ref[...], w_ref[...], preferred_element_type=jnp.float32)
    y = y + b_ref[...].astype(jnp.float32)
    o_ref[...] = _apply_activation(y, activation).astype(o_ref.dtype)


def _linear_tiled_kernel(x_ref, w_ref, b_ref, o_ref, acc_ref, *, activation):
    k = pl.program_id(2)

    @pl.when(k == 0)
    def _init():
        acc_ref[...] = jnp.zeros_like(acc_ref)

    acc_ref[...] += jnp.dot(x_ref[...], w_ref[...], preferred_element_type=jnp.float32)

    @pl.when(k == pl.num_programs(2) - 1)
    def _fin():
        y = acc_ref[...] + b_ref[...].astype(jnp.float32)
        o_ref[...] = _apply_activation(y, activation).astype(o_ref.dtype)


def pallas_linear(x, w, b, activation=None, out_dtype=jnp.bfloat16,
                  tm_cap=512, tn_cap=512, tk_cap=512):
    m, kdim = x.shape
    n = w.shape[1]
    tm = _pick_tile(m, tm_cap)
    w_bytes = kdim * n * jnp.dtype(w.dtype).itemsize

    if w_bytes <= _RESIDENT_WEIGHT_BYTES:
        # Weight streams from HBM exactly once; grid only over M.
        kernel = functools.partial(_linear_resident_kernel, activation=activation)
        return pl.pallas_call(
            kernel,
            out_shape=jax.ShapeDtypeStruct((m, n), out_dtype),
            grid_spec=pltpu.PrefetchScalarGridSpec(
                num_scalar_prefetch=0,
                grid=(m // tm,),
                in_specs=[
                    pl.BlockSpec((tm, kdim), lambda i: (i, 0)),
                    pl.BlockSpec((kdim, n), lambda i: (0, 0)),
                    pl.BlockSpec((1, n), lambda i: (0, 0)),
                ],
                out_specs=pl.BlockSpec((tm, n), lambda i: (i, 0)),
            ),
            compiler_params=pltpu.CompilerParams(
                dimension_semantics=("parallel",),
                vmem_limit_bytes=_VMEM_LIMIT_BYTES,
            ),
        )(x, w, b.reshape(1, n))

    # Fallback: weight too large to keep resident -> classic (i, j, k) tiling with f32 accumulator.
    tn = _pick_tile(n, tn_cap)
    tk = _pick_tile(kdim, tk_cap)
    grid = (m // tm, n // tn, kdim // tk)
    kernel = functools.partial(_linear_tiled_kernel, activation=activation)
    return pl.pallas_call(
        kernel,
        out_shape=jax.ShapeDtypeStruct((m, n), out_dtype),
        grid_spec=pltpu.PrefetchScalarGridSpec(
            num_scalar_prefetch=0,
            grid=grid,
            in_specs=[
                pl.BlockSpec((tm, tk), lambda i, j, k: (i, k)),
                pl.BlockSpec((tk, tn), lambda i, j, k: (k, j)),
                pl.BlockSpec((1, tn), lambda i, j, k: (0, j)),
            ],
            out_specs=pl.BlockSpec((tm, tn), lambda i, j, k: (i, j)),
            scratch_shapes=[pltpu.VMEM((tm, tn), jnp.float32)],
        ),
        compiler_params=pltpu.CompilerParams(
            dimension_semantics=("parallel", "parallel", "arbitrary"),
            vmem_limit_bytes=_VMEM_LIMIT_BYTES,
        ),
    )(x, w, b.reshape(1, n))


# --------------- linear + bias + residual + LayerNorm (fused epilogue) ----------------


def _linear_res_ln_resident_kernel(x_ref, w_ref, b_ref, res_ref, g_ref, beta_ref, o_ref):
    y = (jnp.dot(x_ref[...], w_ref[...], preferred_element_type=jnp.float32)
         + b_ref[...].astype(jnp.float32)
         + res_ref[...].astype(jnp.float32))
    mu = jnp.mean(y, axis=-1, keepdims=True)
    yc = y - mu
    var = jnp.mean(yc * yc, axis=-1, keepdims=True)
    inv = jax.lax.rsqrt(var + 1e-12)  # BERT LayerNorm eps
    o_ref[...] = (yc * inv * g_ref[...].astype(jnp.float32)
                  + beta_ref[...].astype(jnp.float32)).astype(o_ref.dtype)


def _linear_res_ln_tiled_kernel(x_ref, w_ref, b_ref, res_ref, g_ref, beta_ref, o_ref, acc_ref):
    k = pl.program_id(1)

    @pl.when(k == 0)
    def _init():
        acc_ref[...] = jnp.zeros_like(acc_ref)

    acc_ref[...] += jnp.dot(x_ref[...], w_ref[...], preferred_element_type=jnp.float32)

    @pl.when(k == pl.num_programs(1) - 1)
    def _fin():
        y = (acc_ref[...]
             + b_ref[...].astype(jnp.float32)
             + res_ref[...].astype(jnp.float32))
        mu = jnp.mean(y, axis=-1, keepdims=True)
        yc = y - mu
        var = jnp.mean(yc * yc, axis=-1, keepdims=True)
        inv = jax.lax.rsqrt(var + 1e-12)
        o_ref[...] = (yc * inv * g_ref[...].astype(jnp.float32)
                      + beta_ref[...].astype(jnp.float32)).astype(o_ref.dtype)


def pallas_linear_res_ln(x, w, b, residual, gamma, beta, out_dtype=jnp.bfloat16,
                         tm_cap=512, tk_cap=512):
    # N is never tiled: the full output row is needed for the LayerNorm statistics.
    m, kdim = x.shape
    n = w.shape[1]
    tm = _pick_tile(m, tm_cap)
    w_bytes = kdim * n * jnp.dtype(w.dtype).itemsize

    if w_bytes <= _RESIDENT_WEIGHT_BYTES:
        return pl.pallas_call(
            _linear_res_ln_resident_kernel,
            out_shape=jax.ShapeDtypeStruct((m, n), out_dtype),
            grid_spec=pltpu.PrefetchScalarGridSpec(
                num_scalar_prefetch=0,
                grid=(m // tm,),
                in_specs=[
                    pl.BlockSpec((tm, kdim), lambda i: (i, 0)),
                    pl.BlockSpec((kdim, n), lambda i: (0, 0)),
                    pl.BlockSpec((1, n), lambda i: (0, 0)),
                    pl.BlockSpec((tm, n), lambda i: (i, 0)),
                    pl.BlockSpec((1, n), lambda i: (0, 0)),
                    pl.BlockSpec((1, n), lambda i: (0, 0)),
                ],
                out_specs=pl.BlockSpec((tm, n), lambda i: (i, 0)),
            ),
            compiler_params=pltpu.CompilerParams(
                dimension_semantics=("parallel",),
                vmem_limit_bytes=_VMEM_LIMIT_BYTES,
            ),
        )(x, w, b.reshape(1, n), residual, gamma.reshape(1, n), beta.reshape(1, n))

    tk = _pick_tile(kdim, tk_cap)
    grid = (m // tm, kdim // tk)
    return pl.pallas_call(
        _linear_res_ln_tiled_kernel,
        out_shape=jax.ShapeDtypeStruct((m, n), out_dtype),
        grid_spec=pltpu.PrefetchScalarGridSpec(
            num_scalar_prefetch=0,
            grid=grid,
            in_specs=[
                pl.BlockSpec((tm, tk), lambda i, k: (i, k)),
                pl.BlockSpec((tk, n), lambda i, k: (k, 0)),
                pl.BlockSpec((1, n), lambda i, k: (0, 0)),
                pl.BlockSpec((tm, n), lambda i, k: (i, 0)),
                pl.BlockSpec((1, n), lambda i, k: (0, 0)),
                pl.BlockSpec((1, n), lambda i, k: (0, 0)),
            ],
            out_specs=pl.BlockSpec((tm, n), lambda i, k: (i, 0)),
            scratch_shapes=[pltpu.VMEM((tm, n), jnp.float32)],
        ),
        compiler_params=pltpu.CompilerParams(
            dimension_semantics=("parallel", "arbitrary"),
            vmem_limit_bytes=_VMEM_LIMIT_BYTES,
        ),
    )(x, w, b.reshape(1, n), residual, gamma.reshape(1, n), beta.reshape(1, n))


# ----------------------------- standalone LayerNorm (embeddings) -----------------------


def _layernorm_kernel(x_ref, g_ref, b_ref, o_ref):
    x = x_ref[...].astype(jnp.float32)
    mu = jnp.mean(x, axis=-1, keepdims=True)
    xc = x - mu
    var = jnp.mean(xc * xc, axis=-1, keepdims=True)
    inv = jax.lax.rsqrt(var + 1e-12)
    o_ref[...] = (xc * inv * g_ref[...] + b_ref[...]).astype(o_ref.dtype)


def pallas_layernorm(x, gamma, beta, out_dtype=jnp.bfloat16, tm_cap=512):
    m, h = x.shape
    tm = _pick_tile(m, tm_cap)
    return pl.pallas_call(
        _layernorm_kernel,
        out_shape=jax.ShapeDtypeStruct((m, h), out_dtype),
        grid_spec=pltpu.PrefetchScalarGridSpec(
            num_scalar_prefetch=0,
            grid=(m // tm,),
            in_specs=[
                pl.BlockSpec((tm, h), lambda i: (i, 0)),
                pl.BlockSpec((1, h), lambda i: (0, 0)),
                pl.BlockSpec((1, h), lambda i: (0, 0)),
            ],
            out_specs=pl.BlockSpec((tm, h), lambda i: (i, 0)),
        ),
        compiler_params=pltpu.CompilerParams(dimension_semantics=("parallel",)),
    )(x, gamma.reshape(1, h), beta.reshape(1, h))


# ----------------------------- attention ----------------------------------------------


def _attention_kernel(q_ref, k_ref, v_ref, bias_ref, o_ref, *, scale, hb, dh):
    # q_ref: (1, tq, hb*dh) bf16 ; k_ref/v_ref: (1, S, hb*dh) bf16 ; bias_ref: (1, 1, S) f32
    q2 = q_ref[0]
    k2 = k_ref[0]
    v2 = v_ref[0]
    bias2 = bias_ref[0]  # (1, S) additive attention-mask bias, f32
    outs = []
    for h in range(hb):  # hb is small & static; unrolled per-head 2D matmuls (no relayout needed)
        qh = q2[:, h * dh:(h + 1) * dh]
        kh = k2[:, h * dh:(h + 1) * dh]
        vh = v2[:, h * dh:(h + 1) * dh]
        # QK^T: contract on the last dim of both operands (no in-kernel transpose).
        s = jax.lax.dot_general(
            qh, kh, dimension_numbers=(((1,), (1,)), ((), ())),
            preferred_element_type=jnp.float32) * scale + bias2
        m = jnp.max(s, axis=-1, keepdims=True)
        # exp in bf16: attention is EUP-bound on v6e/v7x and P is needed in bf16 for P@V anyway.
        p = jnp.exp((s - m).astype(jnp.bfloat16))
        denom = jnp.sum(p.astype(jnp.float32), axis=-1, keepdims=True)
        ctx = jnp.dot(p, vh, preferred_element_type=jnp.float32)  # (tq, dh)
        outs.append(ctx * pl.reciprocal(denom, approx=True))
    # Lane-dense (tq, hb*dh) = (tq, 128) store, token-major for the following wo projection.
    o_ref[0] = jnp.concatenate(outs, axis=-1).astype(o_ref.dtype)


def pallas_attention(qkv, bias, n_heads, d_head, scale, out_dtype=jnp.bfloat16, tq_cap=256):
    """qkv: (B, S, 3H) packed [Q|K|V] activations. Returns (B, S, H) context, token-major."""
    # TODO(synk): for very long S, switch to a flash-style online softmax over KV tiles.
    B, S, H3 = qkv.shape
    H = H3 // 3
    hb = min(n_heads, max(1, 128 // d_head))  # pack heads so hb*d_head is lane-dense (128)
    while n_heads % hb != 0:
        hb -= 1
    n_groups = n_heads // hb
    gw = hb * d_head  # column width of one head group
    tq = _pick_tile(S, tq_cap, align=16)  # bf16 sublane alignment
    grid = (B, n_groups, S // tq)

    q_spec = pl.BlockSpec((1, tq, gw), lambda b, g, qi: (b, qi, g))
    k_spec = pl.BlockSpec((1, S, gw), lambda b, g, qi: (b, 0, n_groups + g))
    v_spec = pl.BlockSpec((1, S, gw), lambda b, g, qi: (b, 0, 2 * n_groups + g))
    bias_spec = pl.BlockSpec((1, 1, S), lambda b, g, qi: (b, 0, 0))
    out_spec = pl.BlockSpec((1, tq, gw), lambda b, g, qi: (b, qi, g))

    kernel = functools.partial(_attention_kernel, scale=scale, hb=hb, dh=d_head)
    return pl.pallas_call(
        kernel,
        out_shape=jax.ShapeDtypeStruct((B, S, H), out_dtype),
        grid_spec=pltpu.PrefetchScalarGridSpec(
            num_scalar_prefetch=0,
            grid=grid,
            in_specs=[q_spec, k_spec, v_spec, bias_spec],
            out_specs=out_spec,
        ),
        compiler_params=pltpu.CompilerParams(
            dimension_semantics=("parallel", "parallel", "parallel"),
            vmem_limit_bytes=_VMEM_LIMIT_BYTES,
        ),
    )(qkv, qkv, qkv, bias)


# ----------------------------- classifier head -----------------------------------------


def _head_kernel(seq_ref, pool_ref, wa_ref, wb_ref, b_ref, o_ref, acc_ref, *, inv_s):
    # Streaming mean over the sequence axis, then concat(seq_avg, pooler) @ W + b
    # as a split matmul on the final step.
    t = pl.program_id(0)

    @pl.when(t == 0)
    def _init():
        acc_ref[...] = jnp.zeros_like(acc_ref)

    acc_ref[...] += jnp.sum(seq_ref[...].astype(jnp.float32), axis=1)

    @pl.when(t == pl.num_programs(0) - 1)
    def _fin():
        seq_avg = acc_ref[...] * inv_s
        o_ref[...] = (
            jnp.dot(seq_avg, wa_ref[...], preferred_element_type=jnp.float32)
            + jnp.dot(pool_ref[...], wb_ref[...], preferred_element_type=jnp.float32)
            + b_ref[...]
        )


def pallas_head(seq_out, pooler, wa, wb, b, ts_cap=128):
    B, S, H = seq_out.shape
    C = wa.shape[1]
    ts = _pick_tile(S, ts_cap, align=16)  # bf16 sublane tile is 16 rows
    kernel = functools.partial(_head_kernel, inv_s=1.0 / S)
    # TODO(synk): classifier output width C is tiny (not lane-dense); acceptable since the head is negligible.
    return pl.pallas_call(
        kernel,
        out_shape=jax.ShapeDtypeStruct((B, C), jnp.float32),
        grid_spec=pltpu.PrefetchScalarGridSpec(
            num_scalar_prefetch=0,
            grid=(S // ts,),
            in_specs=[
                pl.BlockSpec((B, ts, H), lambda t: (0, t, 0)),
                pl.BlockSpec((B, H), lambda t: (0, 0)),
                pl.BlockSpec((H, C), lambda t: (0, 0)),
                pl.BlockSpec((H, C), lambda t: (0, 0)),
                pl.BlockSpec((1, C), lambda t: (0, 0)),
            ],
            out_specs=pl.BlockSpec((B, C), lambda t: (0, 0)),
            scratch_shapes=[pltpu.VMEM((B, H), jnp.float32)],
        ),
        compiler_params=pltpu.CompilerParams(dimension_semantics=("arbitrary",)),
    )(seq_out, pooler, wa, wb, b.reshape(1, C))


# ----------------------------- model wrapper -------------------------------------------


def bert_for_class_forward(params, input_ids, input_masks, segment_ids, cfg):
    B, S = input_ids.shape
    H = cfg["hidden"]
    nH = cfg["heads"]
    dH = H // nH

    # Embeddings (gather is glue in plain JAX).
    emb = (
        params["word_emb"][input_ids]
        + params["pos_emb"][jnp.arange(S)][None, :, :]
        + params["type_emb"][segment_ids]
    )
    x = pallas_layernorm(
        emb.reshape(B * S, H), params["emb_ln_g"], params["emb_ln_b"]
    )  # bf16 activations from here on

    # Extended attention mask: (1 - mask) * -10000, broadcast over query rows.
    bias = ((1.0 - input_masks.astype(jnp.float32)) * -10000.0).reshape(B, 1, S)
    scale = 1.0 / (dH ** 0.5)

    for lp in params["layers"]:
        # Fused QKV projection (weights pre-concatenated + pre-cast to bf16 at init time).
        qkv = pallas_linear(x, lp["wqkv"], lp["bqkv"])                 # (B*S, 3H) bf16

        # Attention reads head-group column slices of qkv directly (no HBM head split/merge);
        # the reshape below is a free, contiguous view change.
        ctx = pallas_attention(qkv.reshape(B, S, 3 * H), bias, nH, dH, scale)  # (B, S, H) bf16

        # Attention output projection + bias + residual + LayerNorm (fused epilogue).
        x = pallas_linear_res_ln(
            ctx.reshape(B * S, H), lp["wo"], lp["bo"], x, lp["ln1_g"], lp["ln1_b"]
        )

        # FFN: wi with fused GELU, then wo2 + bias + residual + LayerNorm (fused epilogue).
        inter = pallas_linear(x, lp["wi"], lp["bi"], activation="gelu")
        x = pallas_linear_res_ln(
            inter, lp["wo2"], lp["bo2"], x, lp["ln2_g"], lp["ln2_b"]
        )

    sequence_output = x.reshape(B, S, H)                               # bf16
    cls = sequence_output[:, 0, :]
    pooler_output = pallas_linear(
        cls, params["pool_w"], params["pool_b"], activation="tanh", out_dtype=jnp.float32
    )

    # classifier over concat(mean(sequence_output, dim=1), pooler_output)
    # (reference takes an unmasked mean over all S positions, as in torch.mean(..., dim=1)).
    logit = pallas_head(
        sequence_output, pooler_output, params["cls_wa"], params["cls_wb"], params["cls_b"]
    )
    return logit


def init_params(key, cfg):
    """Params are stored in the layout the kernels consume (wqkv concatenated, matmul weights bf16).
    When loading a real checkpoint, this conversion happens once at load time, not per forward."""
    H, I = cfg["hidden"], cfg["intermediate"]
    V, P, T = cfg["vocab"], cfg["max_pos"], 2
    L, C = cfg["layers"], cfg["n_classes"]
    keys = iter(jax.random.split(key, 64))

    def nrm(shape):
        return 0.02 * jax.random.normal(next(keys), shape, jnp.float32)

    params = {
        "word_emb": nrm((V, H)),
        "pos_emb": nrm((P, H)),
        "type_emb": nrm((T, H)),
        "emb_ln_g": jnp.ones((H,), jnp.float32),
        "emb_ln_b": jnp.zeros((H,), jnp.float32),
        "pool_w": nrm((H, H)).astype(jnp.bfloat16),
        "pool_b": jnp.zeros((H,), jnp.float32),
        # classifier weight (2H, C) split into the seq-avg half and the pooler half
        "cls_wa": nrm((H, C)),
        "cls_wb": nrm((H, C)),
        "cls_b": jnp.zeros((C,), jnp.float32),
        "layers": [],
    }
    for _ in range(L):
        params["layers"].append(
            {
                "wqkv": nrm((H, 3 * H)).astype(jnp.bfloat16),   # pre-concatenated [Wq|Wk|Wv]
                "bqkv": jnp.zeros((3 * H,), jnp.float32),
                "wo": nrm((H, H)).astype(jnp.bfloat16),
                "bo": jnp.zeros((H,), jnp.float32),
                "ln1_g": jnp.ones((H,), jnp.float32),
                "ln1_b": jnp.zeros((H,), jnp.float32),
                "wi": nrm((H, I)).astype(jnp.bfloat16),
                "bi": jnp.zeros((I,), jnp.float32),
                "wo2": nrm((I, H)).astype(jnp.bfloat16),
                "bo2": jnp.zeros((H,), jnp.float32),
                "ln2_g": jnp.ones((H,), jnp.float32),
                "ln2_b": jnp.zeros((H,), jnp.float32),
            }
        )
    return params


if __name__ == "__main__":
    # Small config; hidden=128 / heads=2 keeps the packed attention head-group lane-dense (2*64=128).
    cfg = dict(
        hidden=128, heads=2, intermediate=512, layers=2,
        vocab=64, max_pos=32, n_classes=2, batch=2, seq=16,
    )
    key = jax.random.PRNGKey(0)
    pkey, ikey = jax.random.split(key)
    params = init_params(pkey, cfg)

    B, S = cfg["batch"], cfg["seq"]
    input_ids = jax.random.randint(ikey, (B, S), 0, cfg["vocab"], dtype=jnp.int32)
    segment_ids = jnp.concatenate(
        [jnp.zeros((B, S // 2), jnp.int32), jnp.ones((B, S // 2), jnp.int32)], axis=1
    )
    input_masks = jnp.ones((B, S), jnp.int32)

    logit = bert_for_class_forward(params, input_ids, input_masks, segment_ids, cfg)
    jax.block_until_ready(logit)
    assert logit.shape == (B, cfg["n_classes"])
    print("KERNEL_OK")
</pallas_src>

<mosaic_0001>
module attributes {stable_mosaic.version = 11 : i64} {
  func.func @_layernorm_kernel(%arg0: i32, %arg1: memref<32x128xf32, #tpu.memory_space<vmem>>, %arg2: memref<1x128xf32, #tpu.memory_space<vmem>>, %arg3: memref<1x128xf32, #tpu.memory_space<vmem>>, %arg4: memref<32x128xbf16, #tpu.memory_space<vmem>>) attributes {dimension_semantics = [#tpu.dimension_semantics<parallel>], iteration_bounds = array<i64: 1>, scalar_prefetch = 0 : i64, scratch_operands = 0 : i64, tpu.core_type = #tpu.core_type<tc>, window_params = [{transform_indices = @transform_0, window_bounds = array<i64: 32, 128>}, {pipeline_mode = #tpu.pipeline_mode<synchronous>, transform_indices = @transform_1, window_bounds = array<i64: 1, 128>}, {pipeline_mode = #tpu.pipeline_mode<synchronous>, transform_indices = @transform_2, window_bounds = array<i64: 1, 128>}, {transform_indices = @transform_3, window_bounds = array<i64: 32, 128>}]} {
    %c0 = arith.constant 0 : index
    %c0_0 = arith.constant 0 : index
    %0 = vector.load %arg1[%c0, %c0_0] : memref<32x128xf32, #tpu.memory_space<vmem>>, vector<32x128xf32>
    %cst = arith.constant dense<0.000000e+00> : vector<32xf32>
    %1 = vector.multi_reduction <add>, %0, %cst [1] : vector<32x128xf32> to vector<32xf32>
    %2 = vector.shape_cast %1 : vector<32xf32> to vector<32x1xf32>
    %cst_1 = arith.constant 1.280000e+02 : f32
    %3 = vector.broadcast %cst_1 : f32 to vector<32x1xf32>
    %4 = arith.divf %2, %3 : vector<32x1xf32>
    %5 = vector.broadcast %4 : vector<32x1xf32> to vector<32x128xf32>
    %6 = arith.subf %0, %5 : vector<32x128xf32>
    %7 = arith.mulf %6, %6 : vector<32x128xf32>
    %cst_2 = arith.constant dense<0.000000e+00> : vector<32xf32>
    %8 = vector.multi_reduction <add>, %7, %cst_2 [1] : vector<32x128xf32> to vector<32xf32>
    %9 = vector.shape_cast %8 : vector<32xf32> to vector<32x1xf32>
    %cst_3 = arith.constant 1.280000e+02 : f32
    %10 = vector.broadcast %cst_3 : f32 to vector<32x1xf32>
    %11 = arith.divf %9, %10 : vector<32x1xf32>
    %cst_4 = arith.constant 9.99999996E-13 : f32
    %12 = vector.broadcast %cst_4 : f32 to vector<32x1xf32>
    %13 = arith.addf %11, %12 : vector<32x1xf32>
    %14 = math.rsqrt %13 : vector<32x1xf32>
    %15 = vector.broadcast %14 : vector<32x1xf32> to vector<32x128xf32>
    %16 = arith.mulf %6, %15 : vector<32x128xf32>
    %c0_5 = arith.constant 0 : index
    %c0_6 = arith.constant 0 : index
    %17 = vector.load %arg2[%c0_5, %c0_6] : memref<1x128xf32, #tpu.memory_space<vmem>>, vector<1x128xf32>
    %18 = vector.broadcast %17 : vector<1x128xf32> to vector<32x128xf32>
    %19 = arith.mulf %16, %18 : vector<32x128xf32>
    %c0_7 = arith.constant 0 : index
    %c0_8 = arith.constant 0 : index
    %20 = vector.load %arg3[%c0_7, %c0_8] : memref<1x128xf32, #tpu.memory_space<vmem>>, vector<1x128xf32>
    %21 = vector.broadcast %20 : vector<1x128xf32> to vector<32x128xf32>
    %22 = arith.addf %19, %21 : vector<32x128xf32>
    %23 = arith.truncf %22 : vector<32x128xf32> to vector<32x128xbf16>
    %c0_9 = arith.constant 0 : index
    %c0_10 = arith.constant 0 : index
    %24 = vector.load %arg4[%c0_9, %c0_10] : memref<32x128xbf16, #tpu.memory_space<vmem>>, vector<32x128xbf16>
    tpu.vector_store %arg4[%c0_9, %c0_10], %23 {strides = array<i32>} : memref<32x128xbf16, #tpu.memory_space<vmem>>, vector<32x128xbf16>,
    return
  }
  func.func @transform_0(%arg0: i32) -> (i32, i32) {
    %c0_i32 = arith.constant 0 : i32
    %c0_i32_0 = arith.constant 0 : i32
    return %arg0, %c0_i32 : i32, i32
  }
  func.func @transform_1(%arg0: i32) -> (i32, i32) {
    %c0_i32 = arith.constant 0 : i32
    %c0_i32_0 = arith.constant 0 : i32
    %c0_i32_1 = arith.constant 0 : i32
    return %c0_i32, %c0_i32_0 : i32, i32
  }
  func.func @transform_2(%arg0: i32) -> (i32, i32) {
    %c0_i32 = arith.constant 0 : i32
    %c0_i32_0 = arith.constant 0 : i32
    %c0_i32_1 = arith.constant 0 : i32
    return %c0_i32, %c0_i32_0 : i32, i32
  }
  func.func @transform_3(%arg0: i32) -> (i32, i32) {
    %c0_i32 = arith.constant 0 : i32
    %c0_i32_0 = arith.constant 0 : i32
    return %arg0, %c0_i32 : i32, i32
  }
}

</mosaic_0001>

<bundles_post_ra>
// kernel: tpu_custom_call.1
= control target key start
LH: loop header
LB: loop body
LE: loop exit
PB: predicated region body
PF: predicated region fallthrough
CT: control target
= control target key end

     0   :  { %8 = vsyncpa [#allocation3], 0  ;;  %s276_s0 = inlined_call_operand.hbm [shape: f32[32,128], index: 0, kind: input, shape index: {}]   ;;  %s277_s1 = inlined_call_operand.vmem [shape: f32[1,128], index: 1, kind: input, shape index: {}]   ;;  %s278_s2 = inlined_call_operand.vmem [shape: f32[1,128], index: 2, kind: input, shape index: {}]   ;;  %s279_s3 = inlined_call_operand.hbm [shape: bf16[32,128], index: 3, kind: output, shape index: {}]  }
   0x1   :  { %9 = vsyncpa [#allocation4], 0  ;;  %s220_s12 = smov [#allocation2]   ;;  %s172_s16 = scalar_lea.hbm %s276_s0, 512 }
   0x2   :  { %s15_s13 = sshll.u32 %s220_s12, 4  ;;  %p173_p0 = scmp.ne.s32.totalorder %s276_s0, %s172_s16  ;;  %s16_s13 = int_to_ptr.vmem [resolvable:$true] %s15_s13 }
   0x3   :  { %p176_p1 = scmp.lt.u32.totalorder %s172_s16, %s276_s0 }
   0x5   :  { %p178_p2 = pnand %p176_p1, %p173_p0 }
   0x7   :  { %181 = shalt.err (!%p178_p2)
}
   0x8   :  { %s182_s21 = scalar_lea.vmem %s16_s13, 512  ;;  %p187_p4 = scmp.lt.s32.totalorder %s16_s13, %s16_s13 }
   0x9   :  { %p183_p3 = scmp.ne.s32.totalorder %s16_s13, %s182_s21  ;;  %p188_p5 = scmp.lt.s32.totalorder %s182_s21, %s182_s21 }
   0xb   :  { %p189_p6 = por %p188_p5, %p187_p4 }
   0xd   :  { %p190_p7 = pnand %p189_p6, %p183_p3 }
   0xf   :  { %193 = shalt.err (!%p190_p7)
}
  0x10   :  { %s221_s22 = smov 128   ;;  %s222_s23 = smov 8  }
  0x11   :  { %21 = dma.hbm_to_vmem [thread:$0]  %s276_s0, 512, %s16_s13, [#allocation3], %s221_s22, %s221_s22, %s222_s23  }
  0x12   :  { %216 = dma.done.wait [#allocation3], 512  }
  0x13   :  { %217 = vsyncadd [#allocation3], 4294966784  ;;  %v29_v0 = vld [vmem:[#allocation2] sm:$0xff]  ;;  %v31_v1 = vld [vmem:[#allocation2 + $0x10] sm:$0xff]  ;;  %s223_s29 = smov [#allocation5]  }
  0x14   :  { %33 = vadd.xlane.f32.xlu0 %v29_v0  ;;  %37 = vadd.xlane.f32.xlu1 %v31_v1  ;;  %v30_v2 = vld [vmem:[#allocation2 + $0x8] sm:$0xff]  ;;  %v32_v3 = vld [vmem:[#allocation2 + $0x18] sm:$0xff]  ;;  %v137_v34 = vld [vmem:[%s277_s1] ss:$0 sm:$0xff]  ;;  %s125_s30 = sshll.u32 %s223_s29, 4  ;;  %s126_s30 = int_to_ptr.vmem [resolvable:$true] %s125_s30 }
  0x15   :  { %v138_v40 = vld [vmem:[%s278_s2] ss:$0 sm:$0xff]  ;;  %s194_s1 = scalar_lea.vmem %s126_s30, 256  ;;  %p199_p9 = scmp.lt.s32.totalorder %s126_s30, %s126_s30 }
  0x16   :  { %p195_p8 = scmp.ne.s32.totalorder %s126_s30, %s194_s1  ;;  %p200_p10 = scmp.lt.s32.totalorder %s194_s1, %s194_s1 }
  0x18   :  { %35 = vadd.xlane.f32.xlu0 %v30_v2  ;;  %39 = vadd.xlane.f32.xlu1 %v32_v3  ;;  %p201_p11 = por %p200_p10, %p199_p9 }
  0x1a   :  { %p202_p12 = pnand %p201_p11, %p195_p8 }
  0xa1   :  { %v34_v4 = vpop.xlane.xlu0 %33  ;;  %v38_v5 = vpop.xlane.xlu1 %37 }
  0xa2   :  { %v42_v6 = vmul.f32 0.0078125, %v34_v4  ;;  %v44_v7 = vmul.f32 0.0078125, %v38_v5 }
  0xa4   :  { %v46_v8 = vsub.f32 %v29_v0, %v42_v6  ;;  %v48_v9 = vsub.f32 %v31_v1, %v44_v7 }
  0xa5   :  { %v36_v10 = vpop.xlane.xlu0 %35  ;;  %v40_v11 = vpop.xlane.xlu1 %39 }
  0xa6   :  { %v43_v12 = vmul.f32 0.0078125, %v36_v10  ;;  %v50_v13 = vmul.f32 %v46_v8, %v46_v8  ;;  %v45_v14 = vmul.f32 0.0078125, %v40_v11  ;;  %v52_v17 = vmul.f32 %v48_v9, %v48_v9 }
  0xa8   :  { %v47_v15 = vsub.f32 %v30_v2, %v43_v12  ;;  %54 = vadd.xlane.f32.xlu0 %v50_v13  ;;  %v49_v16 = vsub.f32 %v32_v3, %v45_v14 }
  0xaa   :  { %v51_v18 = vmul.f32 %v47_v15, %v47_v15  ;;  %v53_v19 = vmul.f32 %v49_v16, %v49_v16 }
  0xac   :  { %58 = vadd.xlane.f32.xlu0 %v52_v17  ;;  %56 = vadd.xlane.f32.xlu1 %v51_v18 }
  0xb0   :  { %60 = vadd.xlane.f32.xlu1 %v53_v19 }
 0x135   :  { %v55_v20 = vpop.xlane.xlu0 %54 }
 0x136   :  { %v62_v21 = vmul.f32 0.0078125, %v55_v20 }
 0x138   :  { %v66_v22 = vadd.f32 1e-12, %v62_v21 }
 0x139   :  { %v57_v23 = vpop.xlane.xlu1 %56  ;;  %v59_v24 = vpop.xlane.xlu0 %58 }
 0x13a   :  { %164 = vrsqrt.f32 %v66_v22  ;;  %v63_v25 = vmul.f32 0.0078125, %v57_v23  ;;  %v64_v26 = vmul.f32 0.0078125, %v59_v24 }
 0x13c   :  { %v67_v27 = vadd.f32 1e-12, %v63_v25  ;;  %v68_v28 = vadd.f32 1e-12, %v64_v26 }
 0x13d   :  { %v61_v29 = vpop.xlane.xlu1 %60 }
 0x13e   :  { %166 = vrsqrt.f32 %v67_v27  ;;  %v65_v30 = vmul.f32 0.0078125, %v61_v29 }
 0x13f   :  { %168 = vrsqrt.f32 %v68_v28 }
 0x140   :  { %v69_v31 = vadd.f32 1e-12, %v65_v30 }
 0x142   :  { %170 = vrsqrt.f32 %v69_v31 }
 0x144   :  { %v165_v32 = vpop.eup %164 }
 0x145   :  { %v74_v33 = vmul.f32 %v165_v32, %v46_v8 }
 0x147   :  { %v85_v38 = vmul.f32 %v137_v34, %v74_v33 }
 0x148   :  { %v167_v35 = vpop.eup %166 }
 0x149   :  { %v169_v36 = vpop.eup %168  ;;  %v75_v37 = vmul.f32 %v167_v35, %v47_v15  ;;  %v96_v45 = vadd.f32 %v138_v40, %v85_v38 }
 0x14a   :  { %v76_v39 = vmul.f32 %v169_v36, %v48_v9 }
 0x14b   :  { %v86_v41 = vmul.f32 %v137_v34, %v75_v37 }
 0x14c   :  { %v171_v42 = vpop.eup %170  ;;  %v87_v43 = vmul.f32 %v137_v34, %v76_v39 }
 0x14d   :  { %v77_v44 = vmul.f32 %v171_v42, %v49_v16  ;;  %v97_v46 = vadd.f32 %v138_v40, %v86_v41 }
 0x14e   :  { %v98_v49 = vadd.f32 %v138_v40, %v87_v43 }
 0x14f   :  { %v88_v47 = vmul.f32 %v137_v34, %v77_v44  ;;  %v150_v48 = vpack.c.bf16 %v97_v46, %v96_v45 }
 0x151   :  { %v99_v50 = vadd.f32 %v138_v40, %v88_v47  ;;  %151 = vst [vmem:[#allocation5] sm:$0xff] %v150_v48  }
 0x153   :  { %v155_v51 = vpack.c.bf16 %v99_v50, %v98_v49 }
 0x155   :  { %157 = vst [vmem:[#allocation5 + $0x8] sm:$0xff] %v155_v51  }
 0x156   :  { %205 = shalt.err (!%p202_p12)
}
 0x157   :  { %s206_s5 = scalar_lea.hbm %s279_s3, 256 }
 0x158   :  { %p207_p13 = scmp.ne.s32.totalorder %s279_s3, %s206_s5  ;;  %p210_p0 = scmp.lt.u32.totalorder %s206_s5, %s279_s3 }
 0x15a   :  { %p212_p1 = pnand %p210_p0, %p207_p13 }
 0x15c   :  { %215 = shalt.err (!%p212_p1)
}
 0x15d   :  { %s224_s10 = smov 64   ;;  %s225_s11 = smov 4  }
 0x15e   :  { %131 = dma.vmem_to_hbm [thread:$0]  %s126_s30, 256, %s279_s3, [#allocation4], %s224_s10, %s224_s10, %s225_s11  }
 0x15f   :  { %218 = dma.done.wait [#allocation4], 256  }
 0x160   :  { %219 = vsyncadd [#allocation4], 4294967040 }
 0x161   :  { %135 = vsyncpa [#allocation3], 1 }
 0x162   :  { %136 = vsyncpa [#allocation4], 1 }

</bundles_post_ra>
